<compile_context>
chip_gen: v7x
topology: tpu7x:2x2x1
jax: 0.10.0
libtpu: 0.0.40
codegen_flags: <defaults>
</compile_context>

<pallas_src>
import jax
import jax.numpy as jnp
from jax import lax
from jax.experimental import pallas as pl
from jax.experimental.pallas import tpu as pltpu


def _round_up(x, m):
    return (x + m - 1) // m * m


def _vmem_capacity_bytes():
    try:
        return int(pltpu.get_tpu_info().vmem_capacity_bytes)
    except Exception:
        return 64 << 20          # conservative fallback (v7x per-TC VMEM)


def _vmem_limit_bytes(est, cap):
    # Leave headroom for compiler scratch: never ask for more than ~80% of the
    # physical per-core VMEM (51 MiB on v7x, ~102 MiB on v5e/v6e).
    want = max(48 << 20, 2 * est + (8 << 20))
    return int(min(want, int(0.8 * cap)))


def _deform_vmem_est(tile_p, *, cin, q, h, w, cm, cout, kk, use_bf16):
    """Rough live-VMEM estimate (bytes) for one deform-kernel grid step."""
    isz = 2 if use_bf16 else 4
    return int(2 * cin * q * isz            # resident x (double buffered)
               + 2 * cm * tile_p * 4        # offset/mask tile (x2 buffers)
               + 2 * cout * tile_p * 4      # output tile (x2 buffers)
               + 2 * cout * kk * cin * isz  # conv weight (x2 buffers)
               + kk * cin * tile_p * isz    # deformed-im2col scratch
               + 2 * q * tile_p * isz       # dense tent matrix + broadcast tmp
               + 4 * (2 * h + 2 * w + 8) * tile_p   # wy/wx/iotas/coords
               + (2 << 20))                 # misc slack


# ----------------------------------------------------------------------------
# conv_offset_mask: ordinary Conv2d, windowed per p-tile, one fused matmul.
# ----------------------------------------------------------------------------
def conv_offset_mask_pallas(fea_flat, w_om, b_om, *, kh, kw, stride, dil, wp,
                            p_pad, tile_p, win_pad, vmem_cap):
    """out[b, :, p] = W2d @ im2col(fea_flat)[:, p] + bias on the padded output
    grid of width Wp.  fea_flat is the zero-padded input flattened over
    (Hp, Wp) (plus extra flat zero padding); each p-tile only DMAs the window
    of flat columns it needs."""
    n, cin, lp = fea_flat.shape
    cm = w_om.shape[0]
    kk = kh * kw
    n_pt = p_pad // tile_p

    # (cm, kk*cin) with column order t*cin + c, matching the cols scratch rows.
    w2d = jnp.transpose(w_om, (0, 2, 3, 1)).reshape(cm, kk * cin)
    b2d = b_om.reshape(cm, 1)

    def kernel(fea_hbm, w_ref, b_ref, o_ref, fbuf, cols, sem):
        b = pl.program_id(0)
        pt = pl.program_id(1)
        # Manual windowed DMA: only the columns this p-tile touches.  The DMA
        # is exposed (no cross-step double buffer) but this secondary kernel
        # is tiny compared to the deformable-conv kernel.
        start = pl.multiple_of(pt * (stride * tile_p), 128)
        cp = pltpu.make_async_copy(
            fea_hbm.at[b, :, pl.ds(start, win_pad)], fbuf, sem)
        cp.start()
        cp.wait()
        # Stage the kk shifted slabs (im2col in VMEM) ...
        for t in range(kk):
            i, j = t // kw, t % kw
            base = i * dil * wp + j * dil
            if stride == 1:
                cols[t * cin:(t + 1) * cin, :] = fbuf[:, pl.ds(base, tile_p)]
            else:
                cols[t * cin:(t + 1) * cin, :] = (
                    fbuf[:, pl.ds(base, tile_p, stride=stride)])
        # ... and one K = kk*cin MXU matmul produces the whole tile.
        o_ref[0] = (jnp.dot(w_ref[...], cols[...],
                            preferred_element_type=jnp.float32) + b_ref[...])

    est = int(4 * (cin * win_pad + kk * cin * tile_p + 2 * cm * kk * cin
                   + 4 * cm * tile_p) + (2 << 20))
    return pl.pallas_call(
        kernel,
        out_shape=jax.ShapeDtypeStruct((n, cm, p_pad), jnp.float32),
        grid=(n, n_pt),
        in_specs=[
            pl.BlockSpec(memory_space=pl.ANY),                     # fea (HBM)
            pl.BlockSpec((cm, kk * cin), lambda b, pt: (0, 0)),
            pl.BlockSpec((cm, 1), lambda b, pt: (0, 0)),
        ],
        out_specs=pl.BlockSpec((1, cm, tile_p), lambda b, pt: (b, 0, pt)),
        scratch_shapes=[
            pltpu.VMEM((cin, win_pad), fea_flat.dtype),
            pltpu.VMEM((kk * cin, tile_p), jnp.float32),
            pltpu.SemaphoreType.DMA,
        ],
        compiler_params=pltpu.CompilerParams(
            dimension_semantics=("parallel", "parallel"),
            vmem_limit_bytes=_vmem_limit_bytes(est, vmem_cap),
        ),
    )(fea_flat, w2d, b2d)


# ----------------------------------------------------------------------------
# torchvision.ops.deform_conv2d (modulated) as a Pallas kernel.
# ----------------------------------------------------------------------------
def deform_conv2d_pallas(x_flat, out_om, weight, bias, *, h, w, stride, pad,
                         dil, dg, wp, p_pad, tile_p, use_bf16, vmem_cap):
    n, cin, q = x_flat.shape
    cout, _, kh, kw = weight.shape
    kk = kh * kw
    cg = cin // dg
    cm = out_om.shape[1]          # dg*3*kk: first 2*dg*kk = offsets, rest mask
    n_pt = p_pad // tile_p
    cdt = jnp.bfloat16 if use_bf16 else jnp.float32

    # (Cout, kk*Cin), column order t*Cin + c (matches the cols scratch rows).
    w2d = jnp.transpose(weight, (0, 2, 3, 1)).reshape(cout, kk * cin).astype(cdt)
    b2d = bias.reshape(cout, 1).astype(jnp.float32)

    def kernel(x_ref, om_ref, w_ref, b_ref, o_ref, cols_ref):
        pt = pl.program_id(1)
        om = om_ref[0]                                   # (cm, tile_p) f32
        msk = jax.nn.sigmoid(om[2 * dg * kk:, :])        # (dg*kk, tile_p)

        # In-kernel coordinate generation (no padded (q,1)/(1,P) index inputs).
        pcol = pt * tile_p + lax.broadcasted_iota(jnp.int32, (1, tile_p), 1)
        # oy = pcol // wp via float reciprocal + exact integer correction
        # (avoids a vector integer divide; correction makes it exact).
        oy = jnp.floor(pcol.astype(jnp.float32) * (1.0 / wp)).astype(jnp.int32)
        oy = jnp.where(oy * wp > pcol, oy - 1, oy)
        oy = jnp.where((oy + 1) * wp <= pcol, oy + 1, oy)
        ox = pcol - oy * wp
        byv = (oy * stride - pad).astype(jnp.float32)    # (1, tile_p)
        bxv = (ox * stride - pad).astype(jnp.float32)
        iy = lax.broadcasted_iota(jnp.int32, (h, tile_p), 0).astype(jnp.float32)
        ix = lax.broadcasted_iota(jnp.int32, (w, tile_p), 0).astype(jnp.float32)

        xall = x_ref[0]                                  # (cin, q), cdt
        # NOTE: for large dg*kk (e.g. EDVR dg=8 -> 72 taps) this unrolled
        # Python loop should become lax.fori_loop with pl.ds-indexed om/cols.
        for g in range(dg):
            xg = xall if dg == 1 else xall[g * cg:(g + 1) * cg, :]
            for t in range(kk):
                i, j = t // kw, t % kw
                c0 = 2 * (g * kk + t)
                py = byv + float(i * dil) + om[c0:c0 + 1, :]       # (1, tile_p)
                px = bxv + float(j * dil) + om[c0 + 1:c0 + 2, :]
                # Separable bilinear tent (coordinate math stays f32); the
                # modulation mask is folded into the x-axis factor.  Pixels
                # outside the tent (incl. OOB corners) get an exact 0 weight,
                # matching torchvision's zero OOB contribution.
                wy = jnp.maximum(1.0 - jnp.abs(iy - py), 0.0)      # (h, tile_p)
                wx = (jnp.maximum(1.0 - jnp.abs(ix - px), 0.0)
                      * msk[g * kk + t:g * kk + t + 1, :])         # (w, tile_p)
                if use_bf16:
                    wy = wy.astype(jnp.bfloat16)
                    wx = wx.astype(jnp.bfloat16)
                # One broadcast multiply builds the dense gather matrix.
                # (Free reshape when w is sublane-aligned; a relayout else.)
                wb = (wy[:, None, :] * wx[None, :, :]).reshape(q, tile_p)
                sampled = jnp.dot(xg, wb,                          # (cg, tile_p)
                                  preferred_element_type=jnp.float32)
                cols_ref[t * cin + g * cg:t * cin + (g + 1) * cg, :] = (
                    sampled.astype(cdt))
        # One (Cout, kk*Cin) @ (kk*Cin, tile_p) MXU matmul for the whole tile.
        o_ref[0] = (jnp.dot(w_ref[...], cols_ref[...],
                            preferred_element_type=jnp.float32) + b_ref[...])

    est = _deform_vmem_est(tile_p, cin=cin, q=q, h=h, w=w, cm=cm, cout=cout,
                           kk=kk, use_bf16=use_bf16)
    return pl.pallas_call(
        kernel,
        out_shape=jax.ShapeDtypeStruct((n, cout, p_pad), jnp.float32),
        grid=(n, n_pt),
        in_specs=[
            # x stays resident across the p-tile axis (index_map ignores pt).
            pl.BlockSpec((1, cin, q), lambda b, pt: (b, 0, 0)),
            pl.BlockSpec((1, cm, tile_p), lambda b, pt: (b, 0, pt)),
            pl.BlockSpec((cout, kk * cin), lambda b, pt: (0, 0)),
            pl.BlockSpec((cout, 1), lambda b, pt: (0, 0)),
        ],
        out_specs=pl.BlockSpec((1, cout, tile_p), lambda b, pt: (b, 0, pt)),
        scratch_shapes=[pltpu.VMEM((kk * cin, tile_p), cdt)],
        compiler_params=pltpu.CompilerParams(
            dimension_semantics=("parallel", "parallel"),
            vmem_limit_bytes=_vmem_limit_bytes(est, vmem_cap),
        ),
    )(x_flat, out_om, w2d, b2d)


# ----------------------------------------------------------------------------
# DCN_sep.forward
# ----------------------------------------------------------------------------
def dcn_sep_forward(x, fea, params, *, kernel_size, stride, padding, dilation,
                    dg=1, tile_p=None, use_bf16=True):
    # use_bf16=True (default): bf16 MXU operands with f32 accumulation for the
    # sampling and output matmuls; offsets/mask/coordinates stay in f32.
    kh, kw = kernel_size
    n, cin_x, h, w = x.shape
    _, cin_f, hf, wf = fea.shape
    assert (hf, wf) == (h, w), "x and fea must share spatial dims"
    kk = kh * kw
    cout = params["weight"].shape[0]
    cm = dg * 3 * kk
    q = h * w

    ho = (h + 2 * padding - dilation * (kh - 1) - 1) // stride + 1
    wo = (w + 2 * padding - dilation * (kw - 1) - 1) // stride + 1
    hp, wp = h + 2 * padding, w + 2 * padding

    # Padded output grid: width Wp instead of Wo (extra columns are junk and
    # are sliced off at the end).  Free at stride=1; at stride>1 a per-row
    # Wo-dense mapping would avoid the wasted columns.
    p_valid = ho * wp
    p128 = _round_up(p_valid, 128)

    cap = _vmem_capacity_bytes()
    if tile_p is None:
        budget = cap // 2
        tile_p = 128
        for cand in (1024, 896, 768, 640, 512, 384, 256, 128):
            if cand > p128:
                continue
            if _deform_vmem_est(cand, cin=cin_x, q=q, h=h, w=w, cm=cm,
                                cout=cout, kk=kk, use_bf16=use_bf16) <= budget:
                tile_p = cand
                break
        # Keep >= 2 grid steps when batch == 1 so both TensorCores of a
        # dual-core part (v7x) get work.
        if n == 1 and p128 >= 256 and _round_up(p_valid, tile_p) // tile_p < 2:
            tile_p = max(128, _round_up((p_valid + 1) // 2, 128))
    assert tile_p % 128 == 0
    p_pad = _round_up(p_valid, tile_p)
    n_pt = p_pad // tile_p

    # ---- out = conv_offset_mask(fea) (nn.Conv2d, dilation=1) ---------------
    fea_p = jnp.pad(fea, ((0, 0), (0, 0), (padding, padding),
                          (padding, padding)))
    fea_flat = fea_p.reshape(n, cin_f, hp * wp)
    max_base = (kh - 1) * wp + (kw - 1)
    win = max_base + stride * (tile_p - 1) + 1
    win_pad = _round_up(win, 128)
    lp = max(hp * wp, stride * tile_p * (n_pt - 1) + win_pad)
    if lp > hp * wp:
        fea_flat = jnp.pad(fea_flat, ((0, 0), (0, 0), (0, lp - hp * wp)))

    out_om = conv_offset_mask_pallas(
        fea_flat, params["w_om"], params["b_om"], kh=kh, kw=kw, stride=stride,
        dil=1, wp=wp, p_pad=p_pad, tile_p=tile_p, win_pad=win_pad,
        vmem_cap=cap)                                   # (n, dg*3*kk, p_pad)

    # o1, o2, mask = chunk(out, 3): offset == out[:, :2*dg*kk] and
    # mask == sigmoid(out[:, 2*dg*kk:]); both are consumed directly (sigmoid
    # and modulation fused into the tent weights) inside the kernel below.
    # TODO(synk): the PyTorch module computes mean(|offset|) only to emit a
    # host-side logger warning; data-dependent host logging has no Pallas
    # equivalent, so it is omitted here.

    cdt = jnp.bfloat16 if use_bf16 else jnp.float32
    x_flat = x.reshape(n, cin_x, q).astype(cdt)

    out_flat = deform_conv2d_pallas(
        x_flat, out_om, params["weight"], params["bias"], h=h, w=w,
        stride=stride, pad=padding, dil=dilation, dg=dg, wp=wp, p_pad=p_pad,
        tile_p=tile_p, use_bf16=use_bf16, vmem_cap=cap)  # (n, cout, p_pad)

    return out_flat[:, :, :p_valid].reshape(n, cout, ho, wp)[:, :, :, :wo]


# ----------------------------------------------------------------------------
# Pure-JAX reference (gather-based) to validate the Pallas kernels.
# ----------------------------------------------------------------------------
def ref_forward(x, fea, params, *, kernel_size, stride, padding, dilation, dg):
    kh, kw = kernel_size
    n, cin, h, w = x.shape
    cout = params["weight"].shape[0]
    kk = kh * kw
    ho = (h + 2 * padding - dilation * (kh - 1) - 1) // stride + 1
    wo = (w + 2 * padding - dilation * (kw - 1) - 1) // stride + 1
    p = ho * wo

    out_om = lax.conv_general_dilated(
        fea, params["w_om"], window_strides=(stride, stride),
        padding=((padding, padding), (padding, padding)),
        rhs_dilation=(1, 1),
        dimension_numbers=("NCHW", "OIHW", "NCHW"),
    ) + params["b_om"][None, :, None, None]
    o1, o2, mlog = jnp.split(out_om, 3, axis=1)
    off = jnp.concatenate([o1, o2], axis=1).reshape(n, 2 * dg * kk, p)
    msk = jax.nn.sigmoid(mlog).reshape(n, dg * kk, p)

    xf = x.reshape(n, cin, h * w)
    oh = jnp.arange(p) // wo
    ow = jnp.arange(p) % wo
    cg = cin // dg
    acc = jnp.zeros((n, cout, p), jnp.float32)
    for g in range(dg):
        xg = xf[:, g * cg:(g + 1) * cg]
        for i in range(kh):
            for j in range(kw):
                t = i * kw + j
                dy = off[:, g * 2 * kk + 2 * t]
                dx = off[:, g * 2 * kk + 2 * t + 1]
                py = oh * stride - padding + i * dilation + dy
                px = ow * stride - padding + j * dilation + dx
                y0 = jnp.floor(py)
                x0 = jnp.floor(px)
                ly, lx = py - y0, px - x0
                y0i, x0i = y0.astype(jnp.int32), x0.astype(jnp.int32)

                def corner(yi, xi, wgt):
                    valid = (yi >= 0) & (yi < h) & (xi >= 0) & (xi < w)
                    idx = jnp.clip(yi, 0, h - 1) * w + jnp.clip(xi, 0, w - 1)
                    v = jnp.take_along_axis(
                        xg, jnp.broadcast_to(idx[:, None, :], (n, cg, p)),
                        axis=2)
                    return v * (valid.astype(jnp.float32) * wgt)[:, None, :]

                val = (corner(y0i, x0i, (1 - ly) * (1 - lx))
                       + corner(y0i, x0i + 1, (1 - ly) * lx)
                       + corner(y0i + 1, x0i, ly * (1 - lx))
                       + corner(y0i + 1, x0i + 1, ly * lx))
                col = val * msk[:, g * kk + t][:, None, :]
                wt = params["weight"][:, g * cg:(g + 1) * cg, i, j]
                acc = acc + jnp.einsum("oc,ncp->nop", wt, col)
    out = acc + params["bias"][None, :, None]
    return out.reshape(n, cout, ho, wo)


if __name__ == "__main__":
    N, CIN, COUT, H, W = 2, 4, 8, 16, 16
    K, STRIDE, PAD, DIL, DG = 3, 1, 1, 1, 1

    key = jax.random.PRNGKey(0)
    k1, k2, k3, k4 = jax.random.split(key, 4)
    x = jax.random.normal(k1, (N, CIN, H, W), jnp.float32)
    fea = jax.random.normal(k2, (N, CIN, H, W), jnp.float32)

    # DCNv2.reset_parameters: uniform(-stdv, stdv) weight, zero bias.
    stdv = 1.0 / (CIN * K * K) ** 0.5
    weight = jax.random.uniform(k3, (COUT, CIN, K, K), jnp.float32, -stdv, stdv)
    bias = jnp.zeros((COUT,), jnp.float32)
    cm = DG * 3 * K * K
    # The PyTorch module zero-inits conv_offset_mask; small deterministic
    # random weights are used here so the deformable-sampling path is
    # exercised.
    w_om = 0.1 * jax.random.normal(k4, (cm, CIN, K, K), jnp.float32)
    b_om = jnp.zeros((cm,), jnp.float32)
    params = dict(weight=weight, bias=bias, w_om=w_om, b_om=b_om)

    ref = ref_forward(x, fea, params, kernel_size=(K, K), stride=STRIDE,
                      padding=PAD, dilation=DIL, dg=DG)

    # Strict f32 path; tile_p=128 forced so the multi-p-tile grid (3 tiles over
    # the 288-wide padded grid) is exercised.
    out_f32 = dcn_sep_forward(x, fea, params, kernel_size=(K, K),
                              stride=STRIDE, padding=PAD, dilation=DIL, dg=DG,
                              tile_p=128, use_bf16=False)
    out_f32 = jax.block_until_ready(out_f32)
    err_f32 = float(jnp.max(jnp.abs(out_f32 - ref)))
    assert err_f32 < 2e-3, f"f32 mismatch vs reference: {err_f32}"

    # Default fast path: bf16 MXU operands + VMEM-budget-derived tile_p.
    out_bf16 = dcn_sep_forward(x, fea, params, kernel_size=(K, K),
                               stride=STRIDE, padding=PAD, dilation=DIL, dg=DG)
    out_bf16 = jax.block_until_ready(out_bf16)
    err_bf16 = float(jnp.max(jnp.abs(out_bf16 - ref)))
    assert err_bf16 < 6e-2, f"bf16 mismatch vs reference: {err_bf16}"

    print("KERNEL_OK")
</pallas_src>

<mosaic_0001>
module attributes {stable_mosaic.version = 11 : i64} {
  func.func @kernel(%arg0: i32, %arg1: i32, %arg2: memref<2x4x512xf32, #tpu.memory_space<any>>, %arg3: memref<27x36xf32, #tpu.memory_space<vmem>>, %arg4: memref<27x1xf32, #tpu.memory_space<vmem>>, %arg5: memref<1x27x128xf32, #tpu.memory_space<vmem>>, %arg6: memref<4x256xf32, #tpu.memory_space<vmem>>, %arg7: memref<36x128xf32, #tpu.memory_space<vmem>>, %arg8: memref<!tpu.dma_semaphore, #tpu.memory_space<semaphore_mem>>) attributes {dimension_semantics = [#tpu.dimension_semantics<parallel>, #tpu.dimension_semantics<parallel>], iteration_bounds = array<i64: 2, 3>, scalar_prefetch = 0 : i64, scratch_operands = 3 : i64, tpu.core_type = #tpu.core_type<tc>, window_params = [{}, {pipeline_mode = #tpu.pipeline_mode<synchronous>, transform_indices = @transform_1, window_bounds = array<i64: 27, 36>}, {pipeline_mode = #tpu.pipeline_mode<synchronous>, transform_indices = @transform_2, window_bounds = array<i64: 27, 1>}, {transform_indices = @transform_3, window_bounds = array<i64: 1, 27, 128>}]} {
    %c128_i32 = arith.constant 128 : i32
    %0 = arith.muli %arg1, %c128_i32 : i32
    %1 = tpu.assume_multiple %0, 128 : i32
    %c0_i32 = arith.constant 0 : i32
    %2 = tpu.memref_slice %arg2[%arg0, %c0_i32, %1] : memref<2x4x512xf32, #tpu.memory_space<any>> -> memref<1x4x256xf32, #tpu.memory_space<any>>
    %3 = tpu.memref_squeeze %2 : memref<1x4x256xf32, #tpu.memory_space<any>> -> memref<4x256xf32, #tpu.memory_space<any>>
    tpu.enqueue_dma source(%3 : memref<4x256xf32, #tpu.memory_space<any>>) target(%arg6 : memref<4x256xf32, #tpu.memory_space<vmem>>) target_semaphore(%arg8 : memref<!tpu.dma_semaphore, #tpu.memory_space<semaphore_mem>>)
    %c0_i32_0 = arith.constant 0 : i32
    %4 = tpu.memref_slice %arg2[%arg0, %c0_i32_0, %1] : memref<2x4x512xf32, #tpu.memory_space<any>> -> memref<1x4x256xf32, #tpu.memory_space<any>>
    %5 = tpu.memref_squeeze %4 : memref<1x4x256xf32, #tpu.memory_space<any>> -> memref<4x256xf32, #tpu.memory_space<any>>
    tpu.wait_dma2 semaphore(%arg8 : memref<!tpu.dma_semaphore, #tpu.memory_space<semaphore_mem>>) src(%5 : memref<4x256xf32, #tpu.memory_space<any>>) dst(%arg6 : memref<4x256xf32, #tpu.memory_space<vmem>>)
    %c0 = arith.constant 0 : index
    %c0_1 = arith.constant 0 : index
    %6 = vector.load %arg6[%c0, %c0_1] : memref<4x256xf32, #tpu.memory_space<vmem>>, vector<4x128xf32>
    %c0_2 = arith.constant 0 : index
    %c0_3 = arith.constant 0 : index
    %7 = vector.load %arg7[%c0_2, %c0_3] : memref<36x128xf32, #tpu.memory_space<vmem>>, vector<4x128xf32>
    tpu.vector_store %arg7[%c0_2, %c0_3], %6 {strides = array<i32>} : memref<36x128xf32, #tpu.memory_space<vmem>>, vector<4x128xf32>,
    %c0_4 = arith.constant 0 : index
    %c1 = arith.constant 1 : index
    %8 = vector.load %arg6[%c0_4, %c1] : memref<4x256xf32, #tpu.memory_space<vmem>>, vector<4x128xf32>
    %c4 = arith.constant 4 : index
    %c0_5 = arith.constant 0 : index
    %9 = vector.load %arg7[%c4, %c0_5] : memref<36x128xf32, #tpu.memory_space<vmem>>, vector<4x128xf32>
    tpu.vector_store %arg7[%c4, %c0_5], %8 {strides = array<i32>} : memref<36x128xf32, #tpu.memory_space<vmem>>, vector<4x128xf32>,
    %c0_6 = arith.constant 0 : index
    %c2 = arith.constant 2 : index
    %10 = vector.load %arg6[%c0_6, %c2] : memref<4x256xf32, #tpu.memory_space<vmem>>, vector<4x128xf32>
    %c8 = arith.constant 8 : index
    %c0_7 = arith.constant 0 : index
    %11 = vector.load %arg7[%c8, %c0_7] : memref<36x128xf32, #tpu.memory_space<vmem>>, vector<4x128xf32>
    tpu.vector_store %arg7[%c8, %c0_7], %10 {strides = array<i32>} : memref<36x128xf32, #tpu.memory_space<vmem>>, vector<4x128xf32>,
    %c0_8 = arith.constant 0 : index
    %c18 = arith.constant 18 : index
    %12 = vector.load %arg6[%c0_8, %c18] : memref<4x256xf32, #tpu.memory_space<vmem>>, vector<4x128xf32>
    %c12 = arith.constant 12 : index
    %c0_9 = arith.constant 0 : index
    %13 = vector.load %arg7[%c12, %c0_9] : memref<36x128xf32, #tpu.memory_space<vmem>>, vector<4x128xf32>
    tpu.vector_store %arg7[%c12, %c0_9], %12 {strides = array<i32>} : memref<36x128xf32, #tpu.memory_space<vmem>>, vector<4x128xf32>,
    %c0_10 = arith.constant 0 : index
    %c19 = arith.constant 19 : index
    %14 = vector.load %arg6[%c0_10, %c19] : memref<4x256xf32, #tpu.memory_space<vmem>>, vector<4x128xf32>
    %c16 = arith.constant 16 : index
    %c0_11 = arith.constant 0 : index
    %15 = vector.load %arg7[%c16, %c0_11] : memref<36x128xf32, #tpu.memory_space<vmem>>, vector<4x128xf32>
    tpu.vector_store %arg7[%c16, %c0_11], %14 {strides = array<i32>} : memref<36x128xf32, #tpu.memory_space<vmem>>, vector<4x128xf32>,
    %c0_12 = arith.constant 0 : index
    %c20 = arith.constant 20 : index
    %16 = vector.load %arg6[%c0_12, %c20] : memref<4x256xf32, #tpu.memory_space<vmem>>, vector<4x128xf32>
    %c20_13 = arith.constant 20 : index
    %c0_14 = arith.constant 0 : index
    %17 = vector.load %arg7[%c20_13, %c0_14] : memref<36x128xf32, #tpu.memory_space<vmem>>, vector<4x128xf32>
    tpu.vector_store %arg7[%c20_13, %c0_14], %16 {strides = array<i32>} : memref<36x128xf32, #tpu.memory_space<vmem>>, vector<4x128xf32>,
    %c0_15 = arith.constant 0 : index
    %c36 = arith.constant 36 : index
    %18 = vector.load %arg6[%c0_15, %c36] : memref<4x256xf32, #tpu.memory_space<vmem>>, vector<4x128xf32>
    %c24 = arith.constant 24 : index
    %c0_16 = arith.constant 0 : index
    %19 = vector.load %arg7[%c24, %c0_16] : memref<36x128xf32, #tpu.memory_space<vmem>>, vector<4x128xf32>
    tpu.vector_store %arg7[%c24, %c0_16], %18 {strides = array<i32>} : memref<36x128xf32, #tpu.memory_space<vmem>>, vector<4x128xf32>,
    %c0_17 = arith.constant 0 : index
    %c37 = arith.constant 37 : index
    %20 = vector.load %arg6[%c0_17, %c37] : memref<4x256xf32, #tpu.memory_space<vmem>>, vector<4x128xf32>
    %c28 = arith.constant 28 : index
    %c0_18 = arith.constant 0 : index
    %21 = vector.load %arg7[%c28, %c0_18] : memref<36x128xf32, #tpu.memory_space<vmem>>, vector<4x128xf32>
    tpu.vector_store %arg7[%c28, %c0_18], %20 {strides = array<i32>} : memref<36x128xf32, #tpu.memory_space<vmem>>, vector<4x128xf32>,
    %c0_19 = arith.constant 0 : index
    %c38 = arith.constant 38 : index
    %22 = vector.load %arg6[%c0_19, %c38] : memref<4x256xf32, #tpu.memory_space<vmem>>, vector<4x128xf32>
    %c32 = arith.constant 32 : index
    %c0_20 = arith.constant 0 : index
    %23 = vector.load %arg7[%c32, %c0_20] : memref<36x128xf32, #tpu.memory_space<vmem>>, vector<4x128xf32>
    tpu.vector_store %arg7[%c32, %c0_20], %22 {strides = array<i32>} : memref<36x128xf32, #tpu.memory_space<vmem>>, vector<4x128xf32>,
    %c0_21 = arith.constant 0 : index
    %c0_22 = arith.constant 0 : index
    %24 = vector.load %arg3[%c0_21, %c0_22] : memref<27x36xf32, #tpu.memory_space<vmem>>, vector<27x36xf32>
    %c0_23 = arith.constant 0 : index
    %c0_24 = arith.constant 0 : index
    %25 = vector.load %arg7[%c0_23, %c0_24] : memref<36x128xf32, #tpu.memory_space<vmem>>, vector<36x128xf32>
    %cst = arith.constant dense<0.000000e+00> : vector<27x128xf32>
    %26 = tpu.matmul %24, %25, %cst {dimension_numbers = #tpu.dot_dimension_numbers<[1], [0], [0], [1], [0, 0, 1, 1], [], []>} : vector<27x36xf32>, vector<36x128xf32>, vector<27x128xf32> -> vector<27x128xf32>
    %c0_25 = arith.constant 0 : index
    %c0_26 = arith.constant 0 : index
    %27 = vector.load %arg4[%c0_25, %c0_26] : memref<27x1xf32, #tpu.memory_space<vmem>>, vector<27x1xf32>
    %28 = vector.broadcast %27 : vector<27x1xf32> to vector<27x128xf32>
    %29 = arith.addf %26, %28 : vector<27x128xf32>
    %c0_27 = arith.constant 0 : index
    %c0_28 = arith.constant 0 : index
    %c0_29 = arith.constant 0 : index
    %30 = vector.load %arg5[%c0_27, %c0_28, %c0_29] : memref<1x27x128xf32, #tpu.memory_space<vmem>>, vector<1x27x128xf32>
    %31 = vector.shape_cast %30 : vector<1x27x128xf32> to vector<27x128xf32>
    %32 = vector.shape_cast %29 : vector<27x128xf32> to vector<1x27x128xf32>
    tpu.vector_store %arg5[%c0_27, %c0_28, %c0_29], %32 {strides = array<i32>} : memref<1x27x128xf32, #tpu.memory_space<vmem>>, vector<1x27x128xf32>,
    return
  }
  func.func @transform_1(%arg0: i32, %arg1: i32) -> (i32, i32) {
    %c0_i32 = arith.constant 0 : i32
    %c0_i32_0 = arith.constant 0 : i32
    %c0_i32_1 = arith.constant 0 : i32
    return %c0_i32, %c0_i32_0 : i32, i32
  }
  func.func @transform_2(%arg0: i32, %arg1: i32) -> (i32, i32) {
    %c0_i32 = arith.constant 0 : i32
    %c0_i32_0 = arith.constant 0 : i32
    %c0_i32_1 = arith.constant 0 : i32
    return %c0_i32, %c0_i32_0 : i32, i32
  }
  func.func @transform_3(%arg0: i32, %arg1: i32) -> (i32, i32, i32) {
    %c0_i32 = arith.constant 0 : i32
    %c0_i32_0 = arith.constant 0 : i32
    return %arg0, %c0_i32, %arg1 : i32, i32, i32
  }
}

</mosaic_0001>

<bundles_post_ra>
// kernel: tpu_custom_call.1
= control target key start
LH: loop header
LB: loop body
LE: loop exit
PB: predicated region body
PF: predicated region fallthrough
CT: control target
= control target key end

     0   :  { %8 = vsyncpa [#allocation6], 0  ;;  %s830_s12 = smov 0   ;;  %s832_s13 = smov 0   ;;  %s987_s0 = inlined_call_operand.vmem [shape: f32[2,4,512], index: 0, kind: input, shape index: {}]   ;;  %s988_s1 = inlined_call_operand.hbm [shape: f32[27,36], index: 1, kind: input, shape index: {}]   ;;  %s989_s2 = inlined_call_operand.vmem [shape: f32[27,1], index: 2, kind: input, shape index: {}]   ;;  %s990_s3 = inlined_call_operand.vmem [shape: f32[2,27,384], index: 3, kind: output, shape index: {}]  }
   0x1   :  { %s834_s14 = smov 0   ;;  %s836_s15 = smov 0  }
   0x2   :  { %s838_s16 = smov 0   ;;  %s840_s17 = smov 0  }
   0x3   :  { %s842_s18 = smov 0  }
   0x4 LB: > { %s567_s19 = sadd.s32 4294967295, %s796_s18   ;;  %s23_s20 = sadd.s32 1, %s788_s16  ;;  %s796_s18 = sphi %s842_s18, %s14_s18   ;;  %s792_s17 = sphi %s840_s17, %s1006_s17   ;;  %s788_s16 = sphi %s838_s16, %s1005_s16   ;;  %s784_s15 = sphi %s836_s15, %s1004_s15   ;;  %s780_s14 = sphi %s834_s14, %s1003_s14   ;;  %s776_s13 = sphi %s832_s13, %s1002_s13   ;;  %s772_s12 = sphi %s830_s12, %s1001_s12  }
   0x5   : > { %p24_p0 = scmp.ge.s32.totalorder %s23_s20, 3  ;;  %s26_s21 = sadd.s32 1, %s792_s17 }
   0x6   : > { %s77_s22 = sadd.s32 1, %s776_s13  ;;  %p87_p1 = scmp.ne.s32.totalorder %s776_s13, %s772_s12 }
   0x7   : > { %s1008_s20 = smov (%p24_p0, %s23_s20), 0  ;;  %s1010_s21 = smov (!%p24_p0, %s26_s21), %s792_s17 }
   0x8   : > { %s73_s23 = ssub.s32 %s788_s16, %s1008_s20  ;;  %p88_p2 = scmp.eq.s32.totalorder %s567_s19, 5 }
   0x9   : > { %p28_p3 = scmp.ge.s32.totalorder %s1010_s21, 2  ;;  %p569_p4 = scmp.ge.s32.totalorder %s796_s18, 1 }
   0xa   : > { %p877_p5 = por %p88_p2, %p87_p1  ;;  %p101_p6 = scmp.lt.s32.totalorder %s796_s18, 7 }
   0xb   : > { %s1012_s21 = smov (%p28_p3, %s1010_s21), 0  ;;  %p890_p8 = scmp.eq.s32.totalorder %s567_s19, 0 }
   0xc   : > { %s994_s24 = scalar_select %p877_p5, 1, 0 }
   0xd   : > { %p884_p7 = pnand %p569_p4, %p101_p6  ;;  %s72_s26 = ssub.s32 %s792_s17, %s1012_s21 }
   0xe   : > { %s996_s27 = scalar_select %p890_p8, 1, 0 }
   0xf   : > { %s995_s25 = scalar_select %p884_p7, 1, 0 }
  0x10   : > { %s74_s28 = sor.u32 %s73_s23, %s72_s26  ;;  %p631_p9 = pneg %p884_p7 }
  0x11   : > { %p75_p10 = scmp.eq.s32.totalorder %s74_s28, 0  ;;  %s798_s29 = smov [#allocation5]  }
  0x12   : > { %s113_s30 = sshll.u32 %s798_s29, 4  ;;  %p898_p11 = pnand %p890_p8, %p631_p9  ;;  %s114_s30 = int_to_ptr.vmem [resolvable:$true] %s113_s30 }
  0x13   : > { %s903_s5 = scalar_select %p75_p10, %s776_s13, %s77_s22  }
  0x14   : > { %s708_s8 = scalar_lea.hbm %s988_s1, 512  ;;  %p710_p13 = pneg %p898_p11 }
  0x15   : > { %p709_p12 = scmp.ne.s32.totalorder %s988_s1, %s708_s8  ;;  %p715_p2 = scmp.lt.u32.totalorder %s708_s8, %s988_s1 }
  0x17   : > { %p711_p0 = pnand %p710_p13, %p709_p12 }
  0x19   : > { %p712_p1 = pneg %p711_p0 }
  0x1b   : > { %p717_p3 = pnand %p715_p2, %p712_p1 }
  0x1d   : > { %720 = shalt.err (!%p717_p3)
}
  0x1e   : > { %s721_s22 = scalar_lea.vmem %s114_s30, 512  ;;  %p729_p10 = scmp.lt.s32.totalorder %s114_s30, %s114_s30 }
  0x1f   : > { %p722_p4 = scmp.ne.s32.totalorder %s114_s30, %s721_s22  ;;  %p730_p5 = scmp.lt.s32.totalorder %s721_s22, %s721_s22 }
  0x21   : > { %p724_p6 = pnand %p722_p4, %p710_p13  ;;  %p731_p8 = por %p730_p5, %p729_p10 }
  0x23   : > { %p725_p9 = pneg %p724_p6 }
  0x25   : > { %p732_p7 = pnand %p731_p8, %p725_p9 }
  0x27   : > { %735 = shalt.err (!%p732_p7)
}
  0x28   : > { %s799_s23 = smov 128   ;;  %s800_s26 = smov 8  }
  0x29   : > { %634 = dma.hbm_to_vmem [thread:$0]  (!%p898_p11), %s988_s1, 512, %s114_s30, [#allocation6], %s799_s23, %s799_s23, %s800_s26  }
  0x2a   : > { %p998_p12 = scmp.ne.s32.totalorder %s995_s25, 0 }
  0x2b   : > { %p999_p0 = scmp.ne.s32.totalorder (!%p998_p12), %s996_s27, 0 }
  0x2c   : > { %132 = sbr.rel (%p998_p12) target bundleno = 447 (0x1bf), region = 28 }
  0x33   : > { %765 = dma.done.wait (%p999_p0), [#allocation6], 512  }
  0x34   : > { %767 = vsyncadd (%p999_p0), [#allocation6], 4294966784  ;;  %s145_s6 = sand.u32 1, %s772_s12   ;;  %s574_s7 = sshll.u32 %s780_s14, 7 }
  0x35   : > { %s573_s8 = sshll.u32 %s145_s6, 5  ;;  %s149_s4 = sshra.s32 %s574_s7, 7 }
  0x36   : > { %s575_s9 = sshll.u32 %s784_s15, 2  ;;  %s933_s22 = scalar_lea.vmem [#allocation7], %s573_s8 }
  0x37   : > { %s152_s10 = sadd.s32 %s575_s9, %s149_s4 }
  0x38   : > { %s576_s11 = sshll.u32 %s152_s10, 2 }
  0x39   : > { %s154_s25 = scalar_lea.vmem %s987_s0, %s576_s11 }
  0x3a   : > { %v187_v0 = vld [vmem:[%s154_s25] sm:$0xff] }
  0x3b   : > { %188 = vst [vmem:[#allocation2] sm:$0xff] %v187_v0 }
  0x3c   : > { %196 = vsyncadd [#allocation4], 128 }
  0x3d   : > { %768 = dma.done.wait [#allocation4], 128 }
  0x3e   : > { %769 = vsyncadd [#allocation4], 4294967168  ;;  %s801_s12 = smov 126   ;;  %s802_s27 = smov 127   ;;  %v291_v4 = vld [vmem:[#allocation5] sm:$0xff]  ;;  %vm324_vm0 = vcmask 293888  }
  0x3f   : > { %s803_s23 = smov 110   ;;  %s804_s26 = smov 109   ;;  %v293_v5 = vld [vmem:[#allocation5 + $0x10] sm:$0xff]  ;;  %606 = vmatprep.mubr.msk.f32.mxu0 %vm324_vm0, %v291_v4  ;;  %v809_v6 = vmov 0   ;;  %v301_v7 = vld [vmem:[%s989_s2 + $0x8] sm:$0xff]  ;;  %v302_v9 = vld [vmem:[%s989_s2 + $0x10] sm:$0xff] }
  0x40   : > { %s805_s28 = smov 108   ;;  %s806_s29 = smov 92   ;;  %609 = vmatprep.mubr.msk.f32.mxu1 %vm324_vm0, %v293_v5  ;;  %706 = vset.pattern.permute.xlu1 %v809_v6  ;;  %v300_v8 = vld [vmem:[%s989_s2] sm:$0xff]  ;;  %v303_v10 = vld [vmem:[%s989_s2 + $0x18] sm:$0x7]  ;;  %vm221_vm1 = vcmask 1031168  }
  0x41   : > { %s807_s6 = smov 91   ;;  %s808_s7 = smov 90   ;;  %705 = vset.pattern.permute.xlu0 %v809_v6  ;;  %vm232_vm2 = vcmask 900096   ;;  %vm210_vm3 = vcmask 1039360   ;;  %vm243_vm4 = vcmask 891904   ;;  %vm254_vm5 = vcmask 883712  }
  0x42   : > { %v214_v1 = vld [vmem:[#allocation2] sm:$0xff]  ;;  %vm265_vm6 = vcmask 752640   ;;  %vm276_vm7 = vcmask 744448   ;;  %vm287_vm8 = vcmask 736256   ;;  %vm337_vm9 = vcmask 1043456   ;;  %v292_v42 = vld [vmem:[#allocation5 + $0x8] sm:$0xff] }
  0x43   : > { %v201_v2 = vld [vmem:[#allocation2] sm:$0xf]  ;;  %217 = vrot.lane.b32.xlu1 %v214_v1, %s801_s12  ;;  %v216_v3 = vcombine.high %v214_v1, %v214_v1  ;;  %206 = vrot.lane.b32.xlu0 %v214_v1, %s802_s27  ;;  %v294_v43 = vld [vmem:[#allocation5 + $0x18] sm:$0x7]  ;;  %p1000_p5 = scmp.ne.s32.totalorder %s994_s24, 0 }
  0x44   : > { %202 = vst [vmem:[#allocation3] sm:$0xf] %v201_v2 }
  0x47   : > { %219 = vrot.lane.b32.xlu1 %v216_v3, %s801_s12  ;;  %228 = vrot.lane.b32.xlu0 %v214_v1, %s803_s23  ;;  %s626_s12 = smul.u32 (%p1000_p5), 12, %s784_s15 }
  0x4b   : > { %230 = vrot.lane.b32.xlu1 %v216_v3, %s803_s23  ;;  %208 = vrot.lane.b32.xlu0 %v216_v3, %s802_s27  ;;  %s438_s27 = sadd.s32 (%p1000_p5), %s780_s14, %s626_s12 }
  0x4c   : > { %s583_s23 = sshll.u32 (%p1000_p5), %s438_s27, 3 }
  0x4f   : > { %241 = vrot.lane.b32.xlu1 %v216_v3, %s804_s26  ;;  %239 = vrot.lane.b32.xlu0 %v214_v1, %s804_s26 }
  0x53   : > { %252 = vrot.lane.b32.xlu1 %v216_v3, %s805_s28  ;;  %250 = vrot.lane.b32.xlu0 %v214_v1, %s805_s28 }
  0x57   : > { %263 = vrot.lane.b32.xlu1 %v216_v3, %s806_s29  ;;  %261 = vrot.lane.b32.xlu0 %v214_v1, %s806_s29  ;;  %s440_s29 = scalar_lea.vmem (%p1000_p5), %s990_s3, %s583_s23 }
  0x5b   : > { %274 = vrot.lane.b32.xlu1 %v216_v3, %s807_s6  ;;  %272 = vrot.lane.b32.xlu0 %v214_v1, %s807_s6 }
  0x5f   : > { %285 = vrot.lane.b32.xlu1 %v216_v3, %s808_s7  ;;  %283 = vrot.lane.b32.xlu0 %v214_v1, %s808_s7 }
  0x63   : > { %311 = vperm.xlu1 %706, %v301_v7   ;;  %306 = vperm.xlu0 %705, %v300_v8  }
  0x67   : > { %316 = vperm.xlu1 %706, %v302_v9   ;;  %321 = vperm.xlu0 %705, %v303_v10  }
  0xb5   : > { %v218_v11 = vpop.permute.xlu1 %217  ;;  %v207_v12 = vpop.permute.xlu0 %206 }
  0xb9   : > { %v220_v13 = vpop.permute.xlu1 %219  ;;  %v229_v14 = vpop.permute.xlu0 %228 }
  0xba   : > { %v222_v15 = vsel %vm221_vm1, %v218_v11, %v220_v13 }
  0xbb   : > { %224 = vst [vmem:[#allocation3 + $0x8] sm:$0xf] %v222_v15 }
  0xbd   : > { %v231_v16 = vpop.permute.xlu1 %230  ;;  %v209_v17 = vpop.permute.xlu0 %208 }
  0xbe   : > { %v233_v18 = vsel %vm232_vm2, %v229_v14, %v231_v16  ;;  %v211_v19 = vsel %vm210_vm3, %v207_v12, %v209_v17 }
  0xbf   : > { %235 = vst [vmem:[#allocation3 + $0xc] sm:$0xf] %v233_v18  ;;  %213 = vst [vmem:[#allocation3 + $0x4] sm:$0xf] %v211_v19 }
  0xc1   : > { %v242_v20 = vpop.permute.xlu1 %241  ;;  %v240_v21 = vpop.permute.xlu0 %239 }
  0xc2   : > { %v244_v22 = vsel %vm243_vm4, %v240_v21, %v242_v20 }
  0xc3   : > { %246 = vst [vmem:[#allocation3 + $0x10] sm:$0xf] %v244_v22 }
  0xc5   : > { %v253_v23 = vpop.permute.xlu1 %252  ;;  %v251_v24 = vpop.permute.xlu0 %250 }
  0xc6   : > { %v255_v25 = vsel %vm254_vm5, %v251_v24, %v253_v23  ;;  %v295_v26 = vld [vmem:[#allocation3] sm:$0xff]  ;;  %v296_v27 = vld [vmem:[#allocation3 + $0x8] sm:$0xff] }
  0xc7   : > { %257 = vst [vmem:[#allocation3 + $0x14] sm:$0xf] %v255_v25  ;;  %v612_v28 = vpack.c.bf16 %v296_v27, %v295_v26 }
  0xc9   : > { %v264_v29 = vpop.permute.xlu1 %263  ;;  %v262_v30 = vpop.permute.xlu0 %261  ;;  %613 = vmatprep.subr.bf16.mxu0 %v612_v28  ;;  %620 = vmatprep.subr.bf16.mxu1 %v612_v28 }
  0xca   : > { %v266_v31 = vsel %vm265_vm6, %v262_v30, %v264_v29  ;;  %615 = vmatpush3.bf16.msra.mxu0 %v612_v28  ;;  %623 = vmatpush3.bf16.msra.mxu1 %v612_v28 }
  0xcb   : > { %268 = vst [vmem:[#allocation3 + $0x18] sm:$0xf] %v266_v31 }
  0xcd   : > { %v275_v32 = vpop.permute.xlu1 %274  ;;  %v273_v33 = vpop.permute.xlu0 %272 }
  0xce   : > { %v277_v34 = vsel %vm276_vm7, %v273_v33, %v275_v32  ;;  %v297_v38 = vld [vmem:[#allocation3 + $0x10] sm:$0xff] }
  0xcf   : > { %279 = vst [vmem:[#allocation3 + $0x1c] sm:$0xf] %v277_v34 }
  0xd1   : > { %v286_v35 = vpop.permute.xlu1 %285  ;;  %v284_v36 = vpop.permute.xlu0 %283 }
  0xd2   : > { %v288_v37 = vsel %vm287_vm8, %v284_v36, %v286_v35 }
  0xd3   : > { %290 = vst [vmem:[#allocation3 + $0x20] sm:$0xf] %v288_v37 }
  0xd6   : > { %v298_v39 = vld [vmem:[#allocation3 + $0x18] sm:$0xff] }
  0xd7   : > { %v616_v40 = vpack.c.bf16 %v298_v39, %v297_v38 }
  0xd9   : > { %617 = vmatprep.subr.bf16.mxu0 %v616_v40  ;;  %621 = vmatprep.subr.bf16.mxu1 %v616_v40 }
  0xda   : > { %619 = vmatpush3.bf16.msra.mxu0 %v616_v40  ;;  %624 = vmatpush3.bf16.msra.mxu1 %v616_v40  ;;  %v299_v41 = vld [vmem:[#allocation3 + $0x20] sm:$0xf] }
  0xdb   : > { %604 = vmatprep.subr.msk.mxu0 %vm337_vm9, %v299_v41  ;;  %622 = vmatprep.subr.msk.mxu1 %vm337_vm9, %v299_v41 }
  0xde   : > { %605 = vmatpush3.msk.msra.mxu0 %vm337_vm9, %v299_v41  ;;  %625 = vmatpush3.msk.msra.mxu1 %vm337_vm9, %v299_v41 }
  0xdf   : > { %607 = vmatmul.mubr.msk.f32.vlgmr.msra.gmra.mrb[0].mxu0 %vm324_vm0, %v292_v42  ;;  %610 = vmatmul.mubr.msk.f32.vlgmr.msra.gmra.mrb[0].mxu1 %vm324_vm0, %v294_v43 }
  0xe2   : > { %v312_v44 = vpop.permute.xlu1 %311  ;;  %v307_v45 = vpop.permute.xlu0 %306 }
  0xe6   : > { %v317_v46 = vpop.permute.xlu1 %316  ;;  %v322_v47 = vpop.permute.xlu0 %321 }
 0x1b0   : > { %436 = sbr.rel (!%p1000_p5) target bundleno = 447 (0x1bf), region = 70 }
 0x1b2   : > { %v608_v48 = vpop.f32.mrb[0].mxu0  ;;  %v611_v49 = vpop.f32.mrb[0].mxu1 }
 0x1b3   : > { %v413_v50 = vadd.f32 %v608_v48, %v312_v44  ;;  %v423_v51 = vadd.f32 %v611_v49, %v322_v47  ;;  %v407_v52 = vpop.f32.mrb[1].mxu0  ;;  %v417_v53 = vpop.f32.mrb[1].mxu1 }
 0x1b4   : > { %v408_v54 = vadd.f32 %v407_v52, %v307_v45  ;;  %v418_v55 = vadd.f32 %v417_v53, %v317_v46 }
 0x1b5   : > { %427 = vst [vmem:[%s933_s22 + $0x8] sm:$0xff] %v413_v50  ;;  %429 = vst [vmem:[%s933_s22 + $0x18] sm:$0x7] %v423_v51 }
 0x1b6   : > { %426 = vst [vmem:[%s933_s22] sm:$0xff] %v408_v54  ;;  %428 = vst [vmem:[%s933_s22 + $0x10] sm:$0xff] %v418_v55 }
 0x1bc   : > { %v476_v57 = vld [vmem:[%s933_s22 + $0x8] sm:$0xff]  ;;  %v480_v59 = vld [vmem:[%s933_s22 + $0x18] sm:$0xff] }
 0x1bd   : > { %v474_v56 = vld [vmem:[%s933_s22] sm:$0xff]  ;;  %v478_v58 = vld [vmem:[%s933_s22 + $0x10] sm:$0xff]  ;;  %477 = vst [vmem:[%s440_s29 + $0x18] sm:$0xff] %v476_v57  ;;  %481 = vst [vmem:[%s440_s29 + $0x48] sm:$0xff] %v480_v59 }
 0x1be   : > { %475 = vst [vmem:[%s440_s29] sm:$0xff] %v474_v56  ;;  %479 = vst [vmem:[%s440_s29 + $0x30] sm:$0xff] %v478_v58 }
 0x1bf PF: > { %s14_s18 = sadd.s32 1, %s796_s18   ;;  %s1001_s12 = smov %s776_s13 }
 0x1c0   : > { %p11_p7 = scmp.ge.s32.totalorder %s14_s18, 8   ;;  %s1002_s13 = smov %s903_s5 }
 0x1c1   : > { %s1003_s14 = smov %s788_s16  ;;  %s1004_s15 = smov %s792_s17 }
 0x1c2   : > { %s1005_s16 = smov %s1008_s20  ;;  %s1006_s17 = smov %s1012_s21 }
 0x1c3   :  { %13 = sbr.rel (!%p11_p7) target bundleno = 4 (0x4), region = 141 }
 0x1ca   :  { %497 = vsyncpa [#allocation6], 1 }
 0x1cb   :  { %499 = vsyncpa [#allocation6 + $0x1], 1 }
 0x1cc   :  { %500 = vsyncmov [#allocation4] }
 0x1cf   :  { %s501_s24 = vpop.sfrf %500 }
 0x1d0   :  { %p586_p8 = scmp.ne.s32.totalorder %s501_s24, 0 }
 0x1d2   :  { %505 = shalt.err (%p586_p8)  }

</bundles_post_ra>
